<compile_context>
chip_gen: v5e
topology: v5e:2x2
jax: 0.10.0
libtpu: 0.0.40
codegen_flags: <defaults>
</compile_context>

<pallas_src>
import math
import functools

import jax
import jax.numpy as jnp
from jax import lax
from jax.experimental import pallas as pl
from jax.experimental.pallas import tpu as pltpu


# --------------------------- Pallas kernel -----------------------------------

def _leaky_relu(z, slope=0.2):
    return jnp.where(z >= 0, z, slope * z)


def disc_kernel(x_ref,
                in_wt_ref, in_b_ref, out_wt_ref, out_b_ref,
                w1t_ref, b1_ref, w2t_ref, b2_ref,
                w3t_ref, b3_ref, w4_ref, b4_ref,
                y_ref, *, n_heads, batch_tile, seq_len):
    TB, S, H = batch_tile, seq_len, n_heads
    M = TB * S
    E = in_wt_ref.shape[1] // 3
    Dh = E // H
    scale = 1.0 / math.sqrt(Dh)
    cdt = in_wt_ref.dtype                       # MXU operand dtype (f32 / bf16)

    x = x_ref[...]                              # (M, E), already compute_dtype

    # Fused QKV projection (pre-transposed weight (E, 3E)), f32 accumulation.
    qkv = jnp.dot(x, in_wt_ref[...],
                  preferred_element_type=jnp.float32) + in_b_ref[...]   # (M,3E)

    # (M, E) -> (TB*H, S, Dh): fold all heads into the einsum batch dim so the
    # whole attention is ONE batched einsum pair (no per-head loop/slices).
    def split_heads(t):
        return (t.reshape(TB, S, H, Dh)
                 .transpose(0, 2, 1, 3)
                 .reshape(TB * H, S, Dh))

    q = split_heads(qkv[:, :E] * scale).astype(cdt)
    k = split_heads(qkv[:, E:2 * E]).astype(cdt)
    v = split_heads(qkv[:, 2 * E:]).astype(cdt)

    s = jnp.einsum('bqd,bkd->bqk', q, k,
                   preferred_element_type=jnp.float32)        # (TB*H, S, S)
    s = s - jnp.max(s, axis=-1, keepdims=True)
    p = jnp.exp(s)
    p = p * pl.reciprocal(jnp.sum(p, axis=-1, keepdims=True), approx=True)
    o = jnp.einsum('bqk,bkd->bqd', p.astype(cdt), v,
                   preferred_element_type=jnp.float32)        # (TB*H, S, Dh)

    # Merge heads (contiguous per-head features, PyTorch concat order) and run
    # a single (M, E) @ (E, E) output projection.
    o = o.reshape(TB, H, S, Dh).transpose(0, 2, 1, 3).reshape(M, E)
    attn = jnp.dot(o.astype(cdt), out_wt_ref[...],
                   preferred_element_type=jnp.float32) + out_b_ref[...]  # (M,E)

    # l1..l4 MLP head; weights pre-transposed to (in, out).
    h1 = _leaky_relu(jnp.dot(attn.astype(cdt), w1t_ref[...],
                             preferred_element_type=jnp.float32) + b1_ref[...])
    h2 = _leaky_relu(jnp.dot(h1.astype(cdt), w2t_ref[...],
                             preferred_element_type=jnp.float32) + b2_ref[...])
    h3 = _leaky_relu(jnp.dot(h2.astype(cdt), w3t_ref[...],
                             preferred_element_type=jnp.float32) + b3_ref[...])

    # Final (out_features = 1) layer as a transposed-RHS contraction: result is
    # a lane-dense (1, M) row (no h3 transpose, no masked (M, 1) stores).
    y = lax.dot_general(w4_ref[...], h3.astype(cdt),
                        dimension_numbers=(((1,), (1,)), ((), ())),
                        preferred_element_type=jnp.float32) + b4_ref[...]  # (1,M)
    y_ref[...] = y.reshape(y_ref.shape).astype(y_ref.dtype)


# --------------------------- wrapper ------------------------------------------

def discriminator_forward(x, params, *, n_heads, self_attn=True,
                          batch_tile=None, compute_dtype=jnp.bfloat16):
    """x: (B, enc_in, d_model) float32 -> (B, enc_in, 1) float32."""
    B, S, D = x.shape
    vari_emb = params["vari_emb"]                     # (enc_in, d_model//8)
    # embedding(arange(enc_in)) == the embedding table; broadcast over batch.
    x_cat = jnp.concatenate(
        [x, jnp.broadcast_to(vari_emb[None], (B, S, vari_emb.shape[1]))],
        axis=2)
    E = x_cat.shape[2]
    assert self_attn, "kernel implements the self_attn=True branch"
    assert E % n_heads == 0

    # --- batch tiling ---------------------------------------------------------
    # Target ~1024 rows (TB*S) per grid step so per-step pipeline overhead is
    # amortized, but cap at ceil(B/2) so the parallel grid axis has >= 2 tiles
    # whenever B >= 2 (two v7x TensorCores) and tiny batches are not padded.
    if batch_tile is None:
        rows_target = 1024
        tb_rows = max(1, rows_target // S)
        tb_half = max(1, -(-B // 2))
        batch_tile = max(1, min(tb_rows, tb_half))
    TB = batch_tile
    # Keep the (TB*S, E) x-block sublane-aligned (second-to-last dim % 8 == 0).
    TB *= 8 // math.gcd(TB * S, 8)
    B_pad = -(-B // TB) * TB
    if B_pad != B:
        x_cat = jnp.pad(x_cat, ((0, B_pad - B), (0, 0), (0, 0)))
    n_tiles = B_pad // TB
    M = TB * S

    cdt = compute_dtype
    # x is the only per-step streamed operand: flatten + cast in the wrapper so
    # the kernel sees lane-dense (M, E) blocks in the MXU operand dtype.
    x_flat = x_cat.reshape(B_pad * S, E).astype(cdt)

    # Pre-transpose the weights ONCE in XLA (PyTorch Linear stores (out, in));
    # the kernel never transposes a weight tile.
    in_wt = params["in_w"].T.astype(cdt)              # (E, 3E)
    out_wt = params["out_w"].T.astype(cdt)            # (E, E)
    w1t = params["w1"].T.astype(cdt)                  # (E, 2E)
    w2t = params["w2"].T.astype(cdt)                  # (2E, 2E)
    w3t = params["w3"].T.astype(cdt)                  # (2E, E)
    w4 = params["w4"].astype(cdt)                     # (1, E)
    in_b = params["in_b"].astype(jnp.float32)
    out_b = params["out_b"].astype(jnp.float32)
    b1 = params["b1"].astype(jnp.float32)
    b2 = params["b2"].astype(jnp.float32)
    b3 = params["b3"].astype(jnp.float32)
    b4 = params["b4"].astype(jnp.float32)

    weights = [in_wt, in_b, out_wt, out_b, w1t, b1, w2t, b2, w3t, b3, w4, b4]

    def _full_spec(a):
        zeros = (0,) * a.ndim
        return pl.BlockSpec(a.shape, lambda t, _z=zeros: _z)

    kernel = functools.partial(disc_kernel, n_heads=n_heads,
                               batch_tile=TB, seq_len=S)

    y_slab = pl.pallas_call(
        kernel,
        out_shape=jax.ShapeDtypeStruct((n_tiles, 1, M), jnp.float32),
        grid_spec=pltpu.PrefetchScalarGridSpec(
            num_scalar_prefetch=0,
            grid=(n_tiles,),
            in_specs=[pl.BlockSpec((M, E), lambda t: (t, 0))]
                     + [_full_spec(w) for w in weights],
            out_specs=pl.BlockSpec((1, 1, M), lambda t: (t, 0, 0)),
        ),
        compiler_params=pltpu.CompilerParams(
            dimension_semantics=("parallel",)),
    )(x_flat, *weights)

    # (n_tiles, 1, TB*S) -> (B_pad, S) -> (B, S, 1)
    y = y_slab.reshape(B_pad, S)[:B].reshape(B, S, 1)
    return y


# --------------------------- pure-JAX reference -------------------------------

def reference_forward(x, params, *, n_heads):
    B, S, D = x.shape
    vari_emb = params["vari_emb"]
    x = jnp.concatenate(
        [x, jnp.broadcast_to(vari_emb[None], (B, S, vari_emb.shape[1]))], axis=2)
    E = x.shape[2]
    Dh = E // n_heads

    qkv = jnp.einsum("bse,fe->bsf", x, params["in_w"]) + params["in_b"][0]
    q, k, v = qkv[..., :E], qkv[..., E:2 * E], qkv[..., 2 * E:]
    q = q.reshape(B, S, n_heads, Dh).transpose(0, 2, 1, 3) / math.sqrt(Dh)
    k = k.reshape(B, S, n_heads, Dh).transpose(0, 2, 1, 3)
    v = v.reshape(B, S, n_heads, Dh).transpose(0, 2, 1, 3)
    s = jnp.einsum("bhqd,bhkd->bhqk", q, k)
    p = jax.nn.softmax(s, axis=-1)
    a = jnp.einsum("bhqk,bhkd->bhqd", p, v).transpose(0, 2, 1, 3).reshape(B, S, E)
    a = a @ params["out_w"].T + params["out_b"][0]

    lrelu = lambda z: jnp.where(z >= 0, z, 0.2 * z)
    h = lrelu(a @ params["w1"].T + params["b1"][0])
    h = lrelu(h @ params["w2"].T + params["b2"][0])
    h = lrelu(h @ params["w3"].T + params["b3"][0])
    y = h @ params["w4"].T + params["b4"][0]
    return y


# --------------------------- setup & run ---------------------------------------

def make_params(key, enc_in, d_model, n_heads):
    vari_emb_dim = d_model // 8
    in_dim = d_model + vari_emb_dim
    curr = 2 * in_dim

    shapes = {
        "vari_emb": (enc_in, vari_emb_dim),
        "in_w": (3 * in_dim, in_dim), "in_b": (1, 3 * in_dim),
        "out_w": (in_dim, in_dim),    "out_b": (1, in_dim),
        "w1": (curr, in_dim),         "b1": (1, curr),
        "w2": (curr, curr),           "b2": (1, curr),
        "w3": (curr // 2, curr),      "b3": (1, curr // 2),
        "w4": (1, curr // 2),         "b4": (1, 1),
    }
    params = {}
    keys = jax.random.split(key, len(shapes))
    for k_, (name, shp) in zip(keys, shapes.items()):
        params[name] = (0.05 * jax.random.normal(k_, shp)).astype(jnp.float32)
    return params


if __name__ == "__main__":
    # small shapes consistent with the module
    B, enc_in, d_model, n_heads = 2, 8, 32, 2
    key = jax.random.PRNGKey(0)
    kx, kp, kx2 = jax.random.split(key, 3)

    x = jax.random.normal(kx, (B, enc_in, d_model), dtype=jnp.float32)
    params = make_params(kp, enc_in, d_model, n_heads)

    y_ref = reference_forward(x, params, n_heads=n_heads)

    # f32 MXU operands: tight numeric check.
    y_f32 = discriminator_forward(x, params, n_heads=n_heads,
                                  compute_dtype=jnp.float32)
    y_f32 = jax.block_until_ready(y_f32)
    assert y_f32.shape == (B, enc_in, 1), y_f32.shape
    assert jnp.allclose(y_f32, y_ref, atol=1e-3, rtol=1e-3), (
        float(jnp.max(jnp.abs(y_f32 - y_ref))))

    # Default path: bf16 MXU operands with f32 accumulation (native MXU rate on
    # v5e / v6e / v7x); elementwise math stays f32.
    y_bf16 = discriminator_forward(x, params, n_heads=n_heads)
    y_bf16 = jax.block_until_ready(y_bf16)
    assert y_bf16.shape == (B, enc_in, 1), y_bf16.shape
    assert jnp.allclose(y_bf16, y_ref, atol=5e-2, rtol=5e-2), (
        float(jnp.max(jnp.abs(y_bf16 - y_ref))))

    # Larger batch exercises the big batch-tile path (TB*S rows per grid step,
    # >= 2 parallel tiles for the two v7x TensorCores).
    B2 = 64
    x2 = jax.random.normal(kx2, (B2, enc_in, d_model), dtype=jnp.float32)
    y2_ref = reference_forward(x2, params, n_heads=n_heads)
    y2 = discriminator_forward(x2, params, n_heads=n_heads)
    y2 = jax.block_until_ready(y2)
    assert y2.shape == (B2, enc_in, 1), y2.shape
    assert jnp.allclose(y2, y2_ref, atol=5e-2, rtol=5e-2), (
        float(jnp.max(jnp.abs(y2 - y2_ref))))

    print("KERNEL_OK")
</pallas_src>

<mosaic_0001>
module attributes {stable_mosaic.version = 11 : i64} {
  func.func @disc_kernel(%arg0: i32, %arg1: memref<8x36xf32, #tpu.memory_space<vmem>>, %arg2: memref<36x108xf32, #tpu.memory_space<vmem>>, %arg3: memref<1x108xf32, #tpu.memory_space<vmem>>, %arg4: memref<36x36xf32, #tpu.memory_space<vmem>>, %arg5: memref<1x36xf32, #tpu.memory_space<vmem>>, %arg6: memref<36x72xf32, #tpu.memory_space<vmem>>, %arg7: memref<1x72xf32, #tpu.memory_space<vmem>>, %arg8: memref<72x72xf32, #tpu.memory_space<vmem>>, %arg9: memref<1x72xf32, #tpu.memory_space<vmem>>, %arg10: memref<72x36xf32, #tpu.memory_space<vmem>>, %arg11: memref<1x36xf32, #tpu.memory_space<vmem>>, %arg12: memref<1x36xf32, #tpu.memory_space<vmem>>, %arg13: memref<1x1xf32, #tpu.memory_space<vmem>>, %arg14: memref<1x1x8xf32, #tpu.memory_space<vmem>>) attributes {dimension_semantics = [#tpu.dimension_semantics<parallel>], iteration_bounds = array<i64: 2>, scalar_prefetch = 0 : i64, scratch_operands = 0 : i64, tpu.core_type = #tpu.core_type<tc>, window_params = [{transform_indices = @transform_0, window_bounds = array<i64: 8, 36>}, {pipeline_mode = #tpu.pipeline_mode<synchronous>, transform_indices = @transform_1, window_bounds = array<i64: 36, 108>}, {pipeline_mode = #tpu.pipeline_mode<synchronous>, transform_indices = @transform_2, window_bounds = array<i64: 1, 108>}, {pipeline_mode = #tpu.pipeline_mode<synchronous>, transform_indices = @transform_3, window_bounds = array<i64: 36, 36>}, {pipeline_mode = #tpu.pipeline_mode<synchronous>, transform_indices = @transform_4, window_bounds = array<i64: 1, 36>}, {pipeline_mode = #tpu.pipeline_mode<synchronous>, transform_indices = @transform_5, window_bounds = array<i64: 36, 72>}, {pipeline_mode = #tpu.pipeline_mode<synchronous>, transform_indices = @transform_6, window_bounds = array<i64: 1, 72>}, {pipeline_mode = #tpu.pipeline_mode<synchronous>, transform_indices = @transform_7, window_bounds = array<i64: 72, 72>}, {pipeline_mode = #tpu.pipeline_mode<synchronous>, transform_indices = @transform_8, window_bounds = array<i64: 1, 72>}, {pipeline_mode = #tpu.pipeline_mode<synchronous>, transform_indices = @transform_9, window_bounds = array<i64: 72, 36>}, {pipeline_mode = #tpu.pipeline_mode<synchronous>, transform_indices = @transform_10, window_bounds = array<i64: 1, 36>}, {pipeline_mode = #tpu.pipeline_mode<synchronous>, transform_indices = @transform_11, window_bounds = array<i64: 1, 36>}, {pipeline_mode = #tpu.pipeline_mode<synchronous>, transform_indices = @transform_12, window_bounds = array<i64: 1, 1>}, {transform_indices = @transform_13, window_bounds = array<i64: 1, 1, 8>}]} {
    %c0 = arith.constant 0 : index
    %c0_0 = arith.constant 0 : index
    %0 = vector.load %arg1[%c0, %c0_0] : memref<8x36xf32, #tpu.memory_space<vmem>>, vector<8x36xf32>
    %c0_1 = arith.constant 0 : index
    %c0_2 = arith.constant 0 : index
    %1 = vector.load %arg2[%c0_1, %c0_2] : memref<36x108xf32, #tpu.memory_space<vmem>>, vector<36x108xf32>
    %cst = arith.constant dense<0.000000e+00> : vector<8x108xf32>
    %2 = tpu.matmul %0, %1, %cst {dimension_numbers = #tpu.dot_dimension_numbers<[1], [0], [0], [1], [0, 0, 1, 1], [], []>} : vector<8x36xf32>, vector<36x108xf32>, vector<8x108xf32> -> vector<8x108xf32>
    %c0_3 = arith.constant 0 : index
    %c0_4 = arith.constant 0 : index
    %3 = vector.load %arg3[%c0_3, %c0_4] : memref<1x108xf32, #tpu.memory_space<vmem>>, vector<1x108xf32>
    %4 = vector.broadcast %3 : vector<1x108xf32> to vector<8x108xf32>
    %5 = arith.addf %2, %4 : vector<8x108xf32>
    %6 = vector.extract_strided_slice %5 {offsets = [0, 0], sizes = [8, 36], strides = [1, 1]} : vector<8x108xf32> to vector<8x36xf32>
    %cst_5 = arith.constant 0.235702261 : f32
    %7 = vector.broadcast %cst_5 : f32 to vector<8x36xf32>
    %8 = arith.mulf %6, %7 : vector<8x36xf32>
    %9 = vector.shape_cast %8 : vector<8x36xf32> to vector<1x8x2x18xf32>
    %10 = tpu.transpose %9, [0, 2, 1, 3] : vector<1x8x2x18xf32> -> vector<1x2x8x18xf32>
    %11 = vector.shape_cast %10 : vector<1x2x8x18xf32> to vector<2x8x18xf32>
    %12 = vector.extract_strided_slice %5 {offsets = [0, 36], sizes = [8, 36], strides = [1, 1]} : vector<8x108xf32> to vector<8x36xf32>
    %13 = vector.shape_cast %12 : vector<8x36xf32> to vector<1x8x2x18xf32>
    %14 = tpu.transpose %13, [0, 2, 1, 3] : vector<1x8x2x18xf32> -> vector<1x2x8x18xf32>
    %15 = vector.shape_cast %14 : vector<1x2x8x18xf32> to vector<2x8x18xf32>
    %16 = vector.extract_strided_slice %5 {offsets = [0, 72], sizes = [8, 36], strides = [1, 1]} : vector<8x108xf32> to vector<8x36xf32>
    %17 = vector.shape_cast %16 : vector<8x36xf32> to vector<1x8x2x18xf32>
    %18 = tpu.transpose %17, [0, 2, 1, 3] : vector<1x8x2x18xf32> -> vector<1x2x8x18xf32>
    %19 = vector.shape_cast %18 : vector<1x2x8x18xf32> to vector<2x8x18xf32>
    "tpu.trace_start"() <{level = 10 : i32, message = "bqd,bkd->bqk"}> : () -> ()
    %cst_6 = arith.constant dense<0.000000e+00> : vector<2x8x8xf32>
    %20 = tpu.matmul %11, %15, %cst_6 {dimension_numbers = #tpu.dot_dimension_numbers<[2], [2], [1], [1], [0, 0, 0, 1, 1, 1], [0], [0]>} : vector<2x8x18xf32>, vector<2x8x18xf32>, vector<2x8x8xf32> -> vector<2x8x8xf32>
    "tpu.trace_stop"() : () -> ()
    %cst_7 = arith.constant dense<0xFF800000> : vector<2x8xf32>
    %21 = vector.multi_reduction <maximumf>, %20, %cst_7 [2] : vector<2x8x8xf32> to vector<2x8xf32>
    %22 = vector.shape_cast %21 : vector<2x8xf32> to vector<2x8x1xf32>
    %23 = vector.broadcast %22 : vector<2x8x1xf32> to vector<2x8x8xf32>
    %24 = arith.subf %20, %23 : vector<2x8x8xf32>
    %25 = math.exp %24 : vector<2x8x8xf32>
    %cst_8 = arith.constant dense<0.000000e+00> : vector<2x8xf32>
    %26 = vector.multi_reduction <add>, %25, %cst_8 [2] : vector<2x8x8xf32> to vector<2x8xf32>
    %27 = vector.shape_cast %26 : vector<2x8xf32> to vector<2x8x1xf32>
    %28 = tpu.reciprocal %27 {approx = true} : vector<2x8x1xf32> -> vector<2x8x1xf32>
    %29 = vector.broadcast %28 : vector<2x8x1xf32> to vector<2x8x8xf32>
    %30 = arith.mulf %25, %29 : vector<2x8x8xf32>
    "tpu.trace_start"() <{level = 10 : i32, message = "bqk,bkd->bqd"}> : () -> ()
    %cst_9 = arith.constant dense<0.000000e+00> : vector<2x8x18xf32>
    %31 = tpu.matmul %30, %19, %cst_9 {dimension_numbers = #tpu.dot_dimension_numbers<[2], [1], [1], [2], [0, 0, 0, 1, 1, 2], [0], [0]>} : vector<2x8x8xf32>, vector<2x8x18xf32>, vector<2x8x18xf32> -> vector<2x8x18xf32>
    "tpu.trace_stop"() : () -> ()
    %32 = vector.shape_cast %31 : vector<2x8x18xf32> to vector<1x2x8x18xf32>
    %33 = tpu.transpose %32, [0, 2, 1, 3] : vector<1x2x8x18xf32> -> vector<1x8x2x18xf32>
    %34 = vector.shape_cast %33 : vector<1x8x2x18xf32> to vector<8x36xf32>
    %c0_10 = arith.constant 0 : index
    %c0_11 = arith.constant 0 : index
    %35 = vector.load %arg4[%c0_10, %c0_11] : memref<36x36xf32, #tpu.memory_space<vmem>>, vector<36x36xf32>
    %cst_12 = arith.constant dense<0.000000e+00> : vector<8x36xf32>
    %36 = tpu.matmul %34, %35, %cst_12 {dimension_numbers = #tpu.dot_dimension_numbers<[1], [0], [0], [1], [0, 0, 1, 1], [], []>} : vector<8x36xf32>, vector<36x36xf32>, vector<8x36xf32> -> vector<8x36xf32>
    %c0_13 = arith.constant 0 : index
    %c0_14 = arith.constant 0 : index
    %37 = vector.load %arg5[%c0_13, %c0_14] : memref<1x36xf32, #tpu.memory_space<vmem>>, vector<1x36xf32>
    %38 = vector.broadcast %37 : vector<1x36xf32> to vector<8x36xf32>
    %39 = arith.addf %36, %38 : vector<8x36xf32>
    %c0_15 = arith.constant 0 : index
    %c0_16 = arith.constant 0 : index
    %40 = vector.load %arg6[%c0_15, %c0_16] : memref<36x72xf32, #tpu.memory_space<vmem>>, vector<36x72xf32>
    %cst_17 = arith.constant dense<0.000000e+00> : vector<8x72xf32>
    %41 = tpu.matmul %39, %40, %cst_17 {dimension_numbers = #tpu.dot_dimension_numbers<[1], [0], [0], [1], [0, 0, 1, 1], [], []>} : vector<8x36xf32>, vector<36x72xf32>, vector<8x72xf32> -> vector<8x72xf32>
    %c0_18 = arith.constant 0 : index
    %c0_19 = arith.constant 0 : index
    %42 = vector.load %arg7[%c0_18, %c0_19] : memref<1x72xf32, #tpu.memory_space<vmem>>, vector<1x72xf32>
    %43 = vector.broadcast %42 : vector<1x72xf32> to vector<8x72xf32>
    %44 = arith.addf %41, %43 : vector<8x72xf32>
    %cst_20 = arith.constant 0.000000e+00 : f32
    %45 = vector.broadcast %cst_20 : f32 to vector<8x72xf32>
    %46 = arith.cmpf oge, %44, %45 : vector<8x72xf32>
    %cst_21 = arith.constant 2.000000e-01 : f32
    %47 = vector.broadcast %cst_21 : f32 to vector<8x72xf32>
    %48 = arith.mulf %47, %44 : vector<8x72xf32>
    %49 = arith.select %46, %44, %48 : vector<8x72xi1>, vector<8x72xf32>
    %c0_22 = arith.constant 0 : index
    %c0_23 = arith.constant 0 : index
    %50 = vector.load %arg8[%c0_22, %c0_23] : memref<72x72xf32, #tpu.memory_space<vmem>>, vector<72x72xf32>
    %cst_24 = arith.constant dense<0.000000e+00> : vector<8x72xf32>
    %51 = tpu.matmul %49, %50, %cst_24 {dimension_numbers = #tpu.dot_dimension_numbers<[1], [0], [0], [1], [0, 0, 1, 1], [], []>} : vector<8x72xf32>, vector<72x72xf32>, vector<8x72xf32> -> vector<8x72xf32>
    %c0_25 = arith.constant 0 : index
    %c0_26 = arith.constant 0 : index
    %52 = vector.load %arg9[%c0_25, %c0_26] : memref<1x72xf32, #tpu.memory_space<vmem>>, vector<1x72xf32>
    %53 = vector.broadcast %52 : vector<1x72xf32> to vector<8x72xf32>
    %54 = arith.addf %51, %53 : vector<8x72xf32>
    %cst_27 = arith.constant 0.000000e+00 : f32
    %55 = vector.broadcast %cst_27 : f32 to vector<8x72xf32>
    %56 = arith.cmpf oge, %54, %55 : vector<8x72xf32>
    %cst_28 = arith.constant 2.000000e-01 : f32
    %57 = vector.broadcast %cst_28 : f32 to vector<8x72xf32>
    %58 = arith.mulf %57, %54 : vector<8x72xf32>
    %59 = arith.select %56, %54, %58 : vector<8x72xi1>, vector<8x72xf32>
    %c0_29 = arith.constant 0 : index
    %c0_30 = arith.constant 0 : index
    %60 = vector.load %arg10[%c0_29, %c0_30] : memref<72x36xf32, #tpu.memory_space<vmem>>, vector<72x36xf32>
    %cst_31 = arith.constant dense<0.000000e+00> : vector<8x36xf32>
    %61 = tpu.matmul %59, %60, %cst_31 {dimension_numbers = #tpu.dot_dimension_numbers<[1], [0], [0], [1], [0, 0, 1, 1], [], []>} : vector<8x72xf32>, vector<72x36xf32>, vector<8x36xf32> -> vector<8x36xf32>
    %c0_32 = arith.constant 0 : index
    %c0_33 = arith.constant 0 : index
    %62 = vector.load %arg11[%c0_32, %c0_33] : memref<1x36xf32, #tpu.memory_space<vmem>>, vector<1x36xf32>
    %63 = vector.broadcast %62 : vector<1x36xf32> to vector<8x36xf32>
    %64 = arith.addf %61, %63 : vector<8x36xf32>
    %cst_34 = arith.constant 0.000000e+00 : f32
    %65 = vector.broadcast %cst_34 : f32 to vector<8x36xf32>
    %66 = arith.cmpf oge, %64, %65 : vector<8x36xf32>
    %cst_35 = arith.constant 2.000000e-01 : f32
    %67 = vector.broadcast %cst_35 : f32 to vector<8x36xf32>
    %68 = arith.mulf %67, %64 : vector<8x36xf32>
    %69 = arith.select %66, %64, %68 : vector<8x36xi1>, vector<8x36xf32>
    %c0_36 = arith.constant 0 : index
    %c0_37 = arith.constant 0 : index
    %70 = vector.load %arg12[%c0_36, %c0_37] : memref<1x36xf32, #tpu.memory_space<vmem>>, vector<1x36xf32>
    %cst_38 = arith.constant dense<0.000000e+00> : vector<1x8xf32>
    %71 = tpu.matmul %70, %69, %cst_38 {dimension_numbers = #tpu.dot_dimension_numbers<[1], [1], [0], [0], [0, 0, 1, 0], [], []>} : vector<1x36xf32>, vector<8x36xf32>, vector<1x8xf32> -> vector<1x8xf32>
    %c0_39 = arith.constant 0 : index
    %c0_40 = arith.constant 0 : index
    %72 = vector.load %arg13[%c0_39, %c0_40] : memref<1x1xf32, #tpu.memory_space<vmem>>, vector<1x1xf32>
    %73 = vector.broadcast %72 : vector<1x1xf32> to vector<1x8xf32>
    %74 = arith.addf %71, %73 : vector<1x8xf32>
    %75 = vector.shape_cast %74 : vector<1x8xf32> to vector<1x1x8xf32>
    %c0_41 = arith.constant 0 : index
    %c0_42 = arith.constant 0 : index
    %c0_43 = arith.constant 0 : index
    %76 = vector.load %arg14[%c0_41, %c0_42, %c0_43] : memref<1x1x8xf32, #tpu.memory_space<vmem>>, vector<1x1x8xf32>
    tpu.vector_store %arg14[%c0_41, %c0_42, %c0_43], %75 {strides = array<i32>} : memref<1x1x8xf32, #tpu.memory_space<vmem>>, vector<1x1x8xf32>,
    return
  }
  func.func @transform_0(%arg0: i32) -> (i32, i32) {
    %c0_i32 = arith.constant 0 : i32
    %c0_i32_0 = arith.constant 0 : i32
    return %arg0, %c0_i32 : i32, i32
  }
  func.func @transform_1(%arg0: i32) -> (i32, i32) {
    %c0_i32 = arith.constant 0 : i32
    %c0_i32_0 = arith.constant 0 : i32
    %c0_i32_1 = arith.constant 0 : i32
    return %c0_i32, %c0_i32_0 : i32, i32
  }
  func.func @transform_2(%arg0: i32) -> (i32, i32) {
    %c0_i32 = arith.constant 0 : i32
    %c0_i32_0 = arith.constant 0 : i32
    %c0_i32_1 = arith.constant 0 : i32
    return %c0_i32, %c0_i32_0 : i32, i32
  }
  func.func @transform_3(%arg0: i32) -> (i32, i32) {
    %c0_i32 = arith.constant 0 : i32
    %c0_i32_0 = arith.constant 0 : i32
    %c0_i32_1 = arith.constant 0 : i32
    return %c0_i32, %c0_i32_0 : i32, i32
  }
  func.func @transform_4(%arg0: i32) -> (i32, i32) {
    %c0_i32 = arith.constant 0 : i32
    %c0_i32_0 = arith.constant 0 : i32
    %c0_i32_1 = arith.constant 0 : i32
    return %c0_i32, %c0_i32_0 : i32, i32
  }
  func.func @transform_5(%arg0: i32) -> (i32, i32) {
    %c0_i32 = arith.constant 0 : i32
    %c0_i32_0 = arith.constant 0 : i32
    %c0_i32_1 = arith.constant 0 : i32
    return %c0_i32, %c0_i32_0 : i32, i32
  }
  func.func @transform_6(%arg0: i32) -> (i32, i32) {
    %c0_i32 = arith.constant 0 : i32
    %c0_i32_0 = arith.constant 0 : i32
    %c0_i32_1 = arith.constant 0 : i32
    return %c0_i32, %c0_i32_0 : i32, i32
  }
  func.func @transform_7(%arg0: i32) -> (i32, i32) {
    %c0_i32 = arith.constant 0 : i32
    %c0_i32_0 = arith.constant 0 : i32
    %c0_i32_1 = arith.constant 0 : i32
    return %c0_i32, %c0_i32_0 : i32, i32
  }
  func.func @transform_8(%arg0: i32) -> (i32, i32) {
    %c0_i32 = arith.constant 0 : i32
    %c0_i32_0 = arith.constant 0 : i32
    %c0_i32_1 = arith.constant 0 : i32
    return %c0_i32, %c0_i32_0 : i32, i32
  }
  func.func @transform_9(%arg0: i32) -> (i32, i32) {
    %c0_i32 = arith.constant 0 : i32
    %c0_i32_0 = arith.constant 0 : i32
    %c0_i32_1 = arith.constant 0 : i32
    return %c0_i32, %c0_i32_0 : i32, i32
  }
  func.func @transform_10(%arg0: i32) -> (i32, i32) {
    %c0_i32 = arith.constant 0 : i32
    %c0_i32_0 = arith.constant 0 : i32
    %c0_i32_1 = arith.constant 0 : i32
    return %c0_i32, %c0_i32_0 : i32, i32
  }
  func.func @transform_11(%arg0: i32) -> (i32, i32) {
    %c0_i32 = arith.constant 0 : i32
    %c0_i32_0 = arith.constant 0 : i32
    %c0_i32_1 = arith.constant 0 : i32
    return %c0_i32, %c0_i32_0 : i32, i32
  }
  func.func @transform_12(%arg0: i32) -> (i32, i32) {
    %c0_i32 = arith.constant 0 : i32
    %c0_i32_0 = arith.constant 0 : i32
    %c0_i32_1 = arith.constant 0 : i32
    return %c0_i32, %c0_i32_0 : i32, i32
  }
  func.func @transform_13(%arg0: i32) -> (i32, i32, i32) {
    %c0_i32 = arith.constant 0 : i32
    %c0_i32_0 = arith.constant 0 : i32
    %c0_i32_1 = arith.constant 0 : i32
    return %arg0, %c0_i32, %c0_i32_0 : i32, i32, i32
  }
}

</mosaic_0001>

<bundles_post_ra>
// kernel: tpu_custom_call.1
= control target key start
LH: loop header
LB: loop body
LE: loop exit
PB: predicated region body
PF: predicated region fallthrough
CT: control target
= control target key end

     0   :  { %s2094_s0 = inlined_call_operand.hbm [shape: f32[16,36], index: 0, kind: input, shape index: {}]   ;;  %s2095_s1 = inlined_call_operand.vmem [shape: f32[36,108], index: 1, kind: input, shape index: {}]   ;;  %s2096_s2 = inlined_call_operand.vmem [shape: f32[1,108], index: 2, kind: input, shape index: {}]   ;;  %s2097_s3 = inlined_call_operand.hbm [shape: f32[36,36], index: 3, kind: input, shape index: {}]   ;;  %s2098_s4 = inlined_call_operand.vmem [shape: f32[1,36], index: 4, kind: input, shape index: {}]   ;;  %s2099_s5 = inlined_call_operand.hbm [shape: f32[36,72], index: 5, kind: input, shape index: {}]   ;;  %s2100_s6 = inlined_call_operand.vmem [shape: f32[1,72], index: 6, kind: input, shape index: {}]   ;;  %s2101_s7 = inlined_call_operand.vmem [shape: f32[72,72], index: 7, kind: input, shape index: {}]   ;;  %s2102_s8 = inlined_call_operand.vmem [shape: f32[1,72], index: 8, kind: input, shape index: {}]   ;;  %s2103_s9 = inlined_call_operand.vmem [shape: f32[72,36], index: 9, kind: input, shape index: {}]   ;;  %s2104_s10 = inlined_call_operand.vmem [shape: f32[1,36], index: 10, kind: input, shape index: {}]   ;;  %s2105_s11 = inlined_call_operand.vmem [shape: f32[1,36], index: 11, kind: input, shape index: {}]   ;;  %s2106_s12 = inlined_call_operand.<no memory space> [shape: f32[1,1], index: 12, kind: input, shape index: {}]   ;;  %s2107_s13 = inlined_call_operand.hbm [shape: f32[2,1,8], index: 13, kind: output, shape index: {}]  }
   0x1   :  { %2113 = sst [smem:[#allocation18_spill]] %s2097_s3  ;;  %v18_v0 = vstv %s2106_s12 }
   0x2   :  { %2114 = sst [smem:[#allocation19_spill]] %s2099_s5  ;;  %19 = vst [vmem:[#allocation2] sm:$0x1] %v18_v0 }
   0x3   :  { %20 = vsyncpa [#allocation4], 0 }
   0x4   :  { %22 = vsyncpa [#allocation4 + $0x1], 0 }
   0x5   :  { %23 = vsyncpa [#allocation7], 0 }
   0x6   :  { %24 = vsyncpa [#allocation5], 0 }
   0x7   :  { %26 = vsyncpa [#allocation5 + $0x1], 0  ;;  %s1695_s27 = smov 0   ;;  %s1697_s28 = smov 0  }
   0x8   :  { %s1699_s29 = smov 0   ;;  %s1701_s30 = smov 0  }
   0x9 LB: > { %2115 = sst [smem:[#allocation13_spill]] %s1597_s27  ;;  %s1719_s16 = sadd.s32 4294967295, %s1609_s30   ;;  %s1609_s30 = sphi %s1701_s30, %s2131_s30   ;;  %s1605_s29 = sphi %s1699_s29, %s2133_s29   ;;  %s1601_s28 = sphi %s1697_s28, %s2135_s28   ;;  %s1597_s27 = sphi %s1695_s27, %s2134_s27  }
   0xa   : > { %2116 = sst [smem:[#allocation14_spill]] %s1605_s29  ;;  %p1325_p0 = scmp.ge.s32.totalorder %s1609_s30, 1 }
   0xb   : > { %s2117_s3 = sld [smem:[#allocation18_spill]]  ;;  %p53_p1 = scmp.eq.s32.totalorder %s1719_s16, 0 }
   0xc   : > { %p341_p2 = scmp.lt.s32.totalorder %s1609_s30, 3  ;;  %s1611_s18 = smov [#allocation6]  }
   0xd   : > { %s360_s19 = sshll.u32 %s1611_s18, 4  ;;  %s2119_s5 = sld [smem:[#allocation19_spill]]  ;;  %s361_s19 = int_to_ptr.vmem [resolvable:$true] %s360_s19 }
   0xe   : > { %p1724_p3 = pnand %p1325_p0, %p341_p2  ;;  %s1612_s23 = smov [#allocation8]  }
   0xf   : > { %s377_s24 = sshll.u32 %s1612_s23, 4  ;;  %s1613_s25 = smov 128   ;;  %s378_s24 = int_to_ptr.vmem [resolvable:$true] %s377_s24 }
  0x10   : > { %p1365_p4 = pneg %p1724_p3  ;;  %s1614_s26 = smov 8  }
  0x11   : > { %s358_s15 = sshll.u32 %s2117_s3, 4  ;;  %s1324_s12 = sadd.s32 4294967294, %s1609_s30   ;;  %s359_s15 = int_to_ptr.hbm [resolvable:$true] %s358_s15 }
  0x12   : > { %p1366_p6 = pnand %p1365_p4, %p53_p1  ;;  %s1738_s14 = sadd.s32 1, %s1609_s30  }
  0x13   : > { %s375_s22 = sshll.u32 %s2119_s5, 4  ;;  %2120 = sst [smem:[#allocation15_spill]] %s1738_s14  ;;  %s376_s22 = int_to_ptr.hbm [resolvable:$true] %s375_s22 }
  0x14   : > { %1368 = dma.hbm_to_vmem [thread:$0]  (!%p1366_p6), %s359_s15, 640, %s361_s19, [#allocation7], %s1613_s25, %s1613_s25, %s1614_s26  }
  0x15   : > { %1371 = dma.hbm_to_vmem [thread:$0]  (!%p1366_p6), %s376_s22, 640, %s378_s24, [#allocation7], %s1613_s25, %s1613_s25, %s1614_s26  }
  0x16   : > { %s36_s18 = ssub.s32 %s1609_s30, %s1738_s14  ;;  %s39_s20 = sadd.s32 1, %s1605_s29 }
  0x17   : > { %p37_p7 = scmp.eq.s32.totalorder %s36_s18, 0  ;;  %p46_p8 = scmp.ne.s32.totalorder %s1605_s29, %s1601_s28 }
  0x18   : > { %p47_p9 = scmp.eq.s32.totalorder %s1609_s30, 0  ;;  %p52_p10 = scmp.ne.s32.totalorder %s1601_s28, %s1597_s27 }
  0x19   : > { %s1749_s21 = scalar_select %p37_p7, %s1605_s29, %s39_s20  }
  0x1a   : > { %p1751_p11 = por %p47_p9, %p46_p8  ;;  %p1757_p12 = por %p53_p1, %p52_p10 }
  0x1b   : > { %2121 = sst [smem:[#allocation16_spill]] %s1749_s21  ;;  %p328_p13 = scmp.eq.s32.totalorder %s1719_s16, 1 }
  0x1c   : > { %p334_p0 = scmp.eq.s32.totalorder %s1324_s12, 1  ;;  %p1382_p2 = scmp.lt.s32.totalorder %s1609_s30, 2 }
  0x1d   : > { %s412_s19 = sand.u32 1, %s1605_s29   ;;  %p1764_p4 = por %p328_p13, %p46_p8 }
  0x1e   : > { %p1768_p6 = por %p334_p0, %p52_p10  ;;  %s1329_s25 = sshll.u32 %s412_s19, 3 }
  0x1f   : > { %s1330_s26 = sshll.u32 %s1609_s30, 3  ;;  %s416_s5 = scalar_lea.vmem [#allocation3], %s1329_s25 }
  0x20   : > { %s2125_s24 = scalar_select %p1768_p6, 1, 0 }
  0x21   : > { %s420_s3 = scalar_lea.hbm %s2094_s0, %s1330_s26  ;;  %s424_s21 = sshll.u32 %s416_s5, 4  ;;  %s425_s21 = int_to_ptr.vmem [resolvable:$true] %s424_s21 }
  0x22   : > { %2126 = sst [smem:[#allocation17_spill]] %s2125_s24  ;;  %s422_s14 = sshll.u32 %s420_s3, 4  ;;  %s423_s14 = int_to_ptr.hbm [resolvable:$true] %s422_s14 }
  0x23   : > { %p1778_p7 = pnand %p1382_p2, %p1751_p11  ;;  %s413_s29 = scalar_lea.sflag [#allocation4], %s412_s19 }
  0x24   : > { %s1509_s27 = sshra.s32 %s423_s14, 4  ;;  %s1516_s3 = scalar_lea.hbm %s2094_s0, 16  ;;  %s1510_s27 = int_to_ptr.hbm [resolvable:$true] %s1509_s27 }
  0x25   : > { %s1511_s24 = scalar_lea.hbm %s1510_s27, 8  ;;  %p1513_p9 = pneg %p1778_p7 }
  0x26   : > { %p1512_p8 = scmp.ne.s32.totalorder %s1510_s27, %s1511_s24  ;;  %p1517_p11 = scmp.lt.s32.totalorder %s1510_s27, %s2094_s0 }
  0x27   : > { %p1518_p0 = scmp.lt.s32.totalorder %s1516_s3, %s1511_s24 }
  0x28   : > { %p1514_p10 = pnand %p1513_p9, %p1512_p8 }
  0x29   : > { %p1519_p2 = por %p1518_p0, %p1517_p11 }
  0x2a   : > { %p1515_p13 = pneg %p1514_p10 }
  0x2c   : > { %p1520_p5 = pnand %p1519_p2, %p1515_p13 }
  0x2e   : > { %1523 = shalt.err (!%p1520_p5)
}
  0x2f   : > { %1375 = dma.hbm_to_vmem [thread:$0]  (!%p1778_p7), %s423_s14, 128, %s425_s21, %s413_s29  }
  0x30   : > { %433 = sbr.rel (%p1724_p3) target bundleno = 1786 (0x6fa), region = 72  ;;  %s1795_s19 = sand.u32 (!%p1724_p3), 1, %s1601_s28  }
  0x31   : > { %s1332_s18 = sshll.u32 (!%p1724_p3), %s1795_s19, 3  ;;  %s436_s20 = scalar_lea.sflag (!%p1724_p3), [#allocation4], %s1795_s19 }
  0x32   : > { %s439_s25 = scalar_lea.vmem (!%p1724_p3), [#allocation3], %s1332_s18 }
  0x35   : > { %1584 = dma.done.wait (%p1757_p12), %s436_s20, 128  }
  0x36   : > { %1586 = vsyncadd (%p1757_p12), %s436_s20, 4294967168 }
  0x37   : > { %1588 = dma.done.wait (%p53_p1), [#allocation7], 1280  }
  0x38   : > { %1590 = vsyncadd (%p53_p1), [#allocation7], 4294966016  ;;  %vm506_vm0 = vcmask 1043456   ;;  %v497_v1 = vld [vmem:[%s2095_s1 + $0x20] sm:$0xf]  ;;  %v496_v2 = vld [vmem:[%s2095_s1 + $0x18] sm:$0xff]  ;;  %s1235_s21 = scalar_lea.hbm %s2107_s13, %s1719_s16 }
  0x39   : > { %1335 = vmatpush.msk.msra.mxu0 %vm506_vm0, %v497_v1  ;;  %v495_v3 = vld [vmem:[%s2095_s1 + $0x10] sm:$0xff]  ;;  %v494_v4 = vld [vmem:[%s2095_s1 + $0x8] sm:$0xff]  ;;  %v493_v5 = vld [vmem:[%s2095_s1] sm:$0xff]  ;;  %vm502_vm1 = vcmask 293888   ;;  %s1615_s18 = smov 110   ;;  %s1616_s20 = smov 92  }
  0x3a   : > { %v492_v6 = vld [vmem:[%s439_s25] sm:$0xff]  ;;  %v1436_v7 = vld [vmem:[%s2096_s2] ss:$0 sm:$0xff]  ;;  %s1617_s27 = smov 56   ;;  %v1618_v14 = vmov 1983009808  }
  0x3b   : > { %522 = vmatpush.msra.mxu0 %v496_v2  ;;  %v539_v15 = vunpack.c.l.s4 %v1618_v14  ;;  %vm536_vm2 = vcmask 1047556   ;;  %v1619_v19 = vmov 1934713408   ;;  %vm821_vm3 = vcmask 146432   ;;  %s1620_s25 = smov 18   ;;  %s491_s15 = scalar_lea.vmem [#allocation9], %s1795_s19 }
  0x3c   : > { %v561_v20 = vunpack.c.l.s4 %v1619_v19  ;;  %vm874_vm4 = vcmask 64512   ;;  %vm1124_vm6 = vcmask 588800   ;;  %s1237_s24 = sshll.u32 %s491_s15, 4  ;;  %s1239_s12 = sshll.u32 %s1235_s21, 4  ;;  %vm1224_vm9 = vcmask 57344   ;;  %s1238_s24 = int_to_ptr.vmem [resolvable:$true] %s1237_s24  ;;  %s1240_s12 = int_to_ptr.hbm [resolvable:$true] %s1239_s12 }
  0x3d   : > { %523 = vmatpush.msra.mxu0 %v495_v3  ;;  %v1827_v17 = vunpack.c.0.s8 %v539_v15  ;;  %s1227_s5 = scalar_lea.sflag [#allocation5], %s1795_s19  ;;  %s1553_s3 = sshra.s32 %s1240_s12, 4  ;;  %s1554_s3 = int_to_ptr.hbm [resolvable:$true] %s1553_s3 }
  0x3e   : > { %v1833_v25 = vunpack.c.0.s8 %v561_v20  ;;  %s1555_s26 = scalar_lea.hbm %s1554_s3, 1  ;;  %p1560_p12 = scmp.lt.s32.totalorder %s1554_s3, %s2107_s13 }
  0x3f   : > { %524 = vmatpush.msra.mxu0 %v494_v4  ;;  %p1556_p1 = scmp.ne.s32.totalorder %s1554_s3, %s1555_s26 }
  0x41   : > { %525 = vmatpush.msra.mxu0 %v493_v5  ;;  %p1557_p3 = pnand %p1556_p1, %p1764_p4 }
  0x42   : > { %1336 = vmatmul.msk.f32.vlgmr.msra.gmra.mxu0 %vm502_vm1, %v492_v6 }
  0x43   : > { %p1558_p5 = pneg %p1557_p3 }
  0xbf   : > { %v527_v8 = vpop.f32.mrf.mxu0 }
  0xc0   : > { %v528_v9 = vadd.f32 %v1436_v7, %v527_v8 }
  0xc2   : > { %627 = vrot.lane.b32.xlu0 %v528_v9, %s1615_s18  ;;  %v530_v12 = vmul.f32 0.23570226, %v528_v9 }
  0xc4   : > { %v535_v18 = vrot.slane %v530_v12, 4  ;;  %v1836_v28 = vperm.slane %v530_v12, %v1827_v17 }
  0xc6   : > { %v537_v23 = vsel %vm536_vm2, 0.0, %v535_v18  ;;  %v558_v41 = vrot.slane %v1836_v28, 4 }
  0xc7   : > { %v1840_v31 = vperm.slane %v537_v23, %v1827_v17 }
  0xc9   : > { %v570_v49 = vrot.slane %v1840_v31, 4 }
  0xca   : > { %629 = vrot.lane.b32.xlu0 %v528_v9, %s1616_s20 }
 0x134   : > { %v628_v10 = vpop.permute.xlu0 %627 }
 0x135   : > { %v1429_v11 = vpack.i.bf16 %v628_v10, %v528_v9  ;;  %631 = vrot.lane.b32.xlu1 %v628_v10, %s1616_s20 }
 0x137   : > { %1430 = vrot.lane.b32.xlu0 %v1429_v11, %s1617_s27 }
 0x13c   : > { %v630_v13 = vpop.permute.xlu0 %629 }
 0x13d   : > { %532 = vrot.lane.b32.xlu1 %v530_v12, %s1615_s18  ;;  %v635_v16 = vrot.slane %v630_v13, 4  ;;  %v640_v22 = vperm.slane %v630_v13, %v1827_v17  ;;  %s1559_s18 = scalar_lea.hbm %s2107_s13, 2 }
 0x13e   : > { %p1561_p7 = scmp.lt.s32.totalorder %s1559_s18, %s1555_s26 }
 0x13f   : > { %v636_v21 = vsel %vm536_vm2, 0.0, %v635_v16  ;;  %v657_v27 = vrot.slane %v640_v22, 4 }
 0x140   : > { %v644_v24 = vperm.slane %v636_v21, %v1827_v17  ;;  %p1562_p8 = por %p1561_p7, %p1560_p12 }
 0x142   : > { %v669_v37 = vrot.slane %v644_v24, 4  ;;  %p1563_p9 = pnand %p1562_p8, %p1558_p5 }
 0x1a7   : > { %v632_v26 = vpop.permute.xlu1 %631 }
 0x1a8   : > { %v645_v29 = vrot.slane %v632_v26, 4  ;;  %v650_v30 = vperm.slane %v632_v26, %v1827_v17 }
 0x1a9   : > { %v1431_v32 = vpop.permute.xlu0 %1430 }
 0x1aa   : > { %v646_v33 = vsel %vm536_vm2, 0.0, %v645_v29  ;;  %v655_v34 = vrot.slane %v650_v30, 4  ;;  %v658_v35 = vsel %vm536_vm2, %v650_v30, %v657_v27  ;;  %v1433_v36 = vunpack.i.h.bf16 %v1431_v32 }
 0x1ab   : > { %v654_v38 = vperm.slane %v646_v33, %v1827_v17  ;;  %v666_v39 = vperm.slane %v658_v35, %v1833_v25  ;;  %v1432_v40 = vunpack.i.l.bf16 %v1431_v32 }
 0x1ac   : > { %v656_v42 = vsel %vm536_vm2, %v655_v34, %v640_v22  ;;  %v741_v43 = vrot.slane %v1433_v36, 4  ;;  %v746_v44 = vperm.slane %v1433_v36, %v1827_v17 }
 0x1ad   : > { %v662_v45 = vperm.slane %v656_v42, %v1833_v25  ;;  %v667_v46 = vrot.slane %v654_v38, 4  ;;  %v670_v47 = vsel %vm536_vm2, %v654_v38, %v669_v37  ;;  %v681_v48 = vrot.slane %v666_v39, 4 }
 0x1ae   : > { %v678_v50 = vperm.slane %v670_v47, %v1833_v25  ;;  %v742_v51 = vsel %vm536_vm2, 0.0, %v741_v43  ;;  %v731_v52 = vrot.slane %v1432_v40, 4  ;;  %v751_v56 = vrot.slane %v746_v44, 4 }
 0x1af   : > { %v668_v53 = vsel %vm536_vm2, %v667_v46, %v644_v24  ;;  %v679_v54 = vrot.slane %v662_v45, 4  ;;  %v682_v55 = vsel %vm536_vm2, 0.0, %v681_v48  ;;  %v533_v57 = vpop.permute.xlu1 %532  ;;  %v1858_v60 = vsel %vm536_vm2, %v681_v48, %v662_v45 }
 0x1b0   : > { %v674_v58 = vperm.slane %v668_v53, %v1833_v25  ;;  %v685_v59 = vrot.slane %v678_v50, 4  ;;  %v750_v61 = vperm.slane %v742_v51, %v1827_v17  ;;  %v692_v62 = vrot.slane %v682_v55, 4 }
 0x1b1   : > { %v732_v63 = vsel %vm536_vm2, 0.0, %v731_v52  ;;  %v736_v0 = vperm.slane %v1432_v40, %v1827_v17  ;;  %v546_v1 = vrot.slane %v533_v57, 4  ;;  %v680_v6 = vsel %vm536_vm2, 0.0, %v679_v54 }
 0x1b2   : > { %v683_v2 = vrot.slane %v674_v58, 4  ;;  %v686_v3 = vsel %vm536_vm2, 0.0, %v685_v59  ;;  %v763_v4 = vrot.slane %v750_v61, 4  ;;  %v740_v5 = vperm.slane %v732_v63, %v1827_v17 }
 0x1b3   : > { %v752_v7 = vsel %vm536_vm2, %v751_v56, %v736_v0  ;;  %v753_v8 = vrot.slane %v736_v0, 4  ;;  %v547_v9 = vsel %vm536_vm2, 0.0, %v546_v1  ;;  %v551_v13 = vperm.slane %v533_v57, %v1827_v17 }
 0x1b4   : > { %v758_v10 = vperm.slane %v752_v7, %v1833_v25  ;;  %v764_v11 = vsel %vm536_vm2, %v763_v4, %v740_v5  ;;  %v765_v12 = vrot.slane %v740_v5, 4  ;;  %v703_v14 = vrot.slane %v686_v3, 4 }
 0x1b5   : > { %v754_v15 = vsel %vm536_vm2, %v746_v44, %v753_v8  ;;  %v1873_v16 = vperm.slane %v764_v11, %v1833_v25  ;;  %v555_v18 = vperm.slane %v547_v9, %v1827_v17  ;;  %v556_v21 = vrot.slane %v551_v13, 4 }
 0x1b6   : > { %v762_v19 = vperm.slane %v754_v15, %v1833_v25  ;;  %v766_v20 = vsel %vm536_vm2, %v750_v61, %v765_v12  ;;  %v684_v22 = vsel %vm536_vm2, 0.0, %v683_v2  ;;  %v775_v24 = vrot.slane %v758_v10, 4 }
 0x1b7   : > { %v774_v23 = vperm.slane %v766_v20, %v1833_v25  ;;  %v559_v26 = vsel %vm536_vm2, %v551_v13, %v558_v41  ;;  %v568_v27 = vrot.slane %v555_v18, 4  ;;  %v779_v30 = vrot.slane %v1873_v16, 4 }
 0x1b8   : > { %v777_v29 = vrot.slane %v762_v19, 4  ;;  %v557_v32 = vsel %vm536_vm2, %v556_v21, %v1836_v28  ;;  %v567_v33 = vperm.slane %v559_v26, %v1833_v25  ;;  %v571_v37 = vsel %vm536_vm2, %v555_v18, %v570_v49 }
 0x1b9   : > { %v781_v34 = vrot.slane %v774_v23, 4  ;;  %v563_v35 = vperm.slane %v557_v32, %v1833_v25  ;;  %v569_v36 = vsel %vm536_vm2, %v568_v27, %v1840_v31  ;;  %v579_v40 = vperm.slane %v571_v37, %v1833_v25 }
 0x1ba   : > { %v778_v38 = vsel %vm536_vm2, 0.0, %v777_v29  ;;  %v575_v39 = vperm.slane %v569_v36, %v1833_v25  ;;  %v582_v41 = vrot.slane %v567_v33, 4  ;;  %v776_v42 = vsel %vm536_vm2, 0.0, %v775_v24 }
 0x1bb   : > { %v782_v28 = vsel %vm536_vm2, 0.0, %v781_v34  ;;  %v788_v43 = vrot.slane %v778_v38, 4  ;;  %v580_v44 = vrot.slane %v563_v35, 4  ;;  %v586_v47 = vrot.slane %v579_v40, 4 }
 0x1bc   : > { %v583_v45 = vsel %vm536_vm2, 0.0, %v582_v41  ;;  %v584_v46 = vrot.slane %v575_v39, 4  ;;  %v691_v31 = vperm.slane %v1858_v60, %v1827_v17  ;;  %v588_v49 = vsel %vm536_vm2, %v582_v41, %v563_v35 }
 0x1bd   : > { %v581_v48 = vsel %vm536_vm2, 0.0, %v580_v44  ;;  %v593_v50 = vrot.slane %v583_v45, 4  ;;  %v693_v51 = vsel %vm536_vm2, %v692_v62, %v680_v6  ;;  %v799_v52 = vrot.slane %v782_v28, 4 }
 0x1be   : > { %v587_v53 = vsel %vm536_vm2, 0.0, %v586_v47  ;;  %v697_v54 = vperm.slane %v693_v51, %v1827_v17  ;;  %v698_v55 = vsel %vm536_vm2, %v685_v59, %v674_v58  ;;  %v592_v56 = vperm.slane %v588_v49, %v1827_v17 }
 0x1bf   : > { %v594_v57 = vsel %vm536_vm2, %v593_v50, %v581_v48  ;;  %v604_v60 = vrot.slane %v587_v53, 4  ;;  %v704_v61 = vsel %vm536_vm2, %v703_v14, %v684_v22  ;;  %v585_v62 = vsel %vm536_vm2, 0.0, %v584_v46 }
 0x1c0   : > { %v708_v63 = vperm.slane %v704_v61, %v1827_v17  ;;  %v709_v0 = vrot.slane %v697_v54, 4  ;;  %v598_v1 = vperm.slane %v594_v57, %v1827_v17  ;;  %v702_v2 = vperm.slane %v698_v55, %v1827_v17 }
 0x1c1   : > { %v599_v3 = vsel %vm536_vm2, %v586_v47, %v575_v39  ;;  %v605_v58 = vsel %vm536_vm2, %v604_v60, %v585_v62  ;;  %v783_v59 = vsel %vm536_vm2, %v777_v29, %v758_v10  ;;  %v780_v7 = vsel %vm536_vm2, 0.0, %v779_v30 }
 0x1c2   : > { %v710_v4 = vsel %vm536_vm2, %v709_v0, %v691_v31  ;;  %v715_v5 = vrot.slane %v708_v63, 4  ;;  %v609_v6 = vperm.slane %v605_v58, %v1827_v17  ;;  %v603_v9 = vperm.slane %v599_v3, %v1827_v17  ;;  %v1042_v3 = vld [vmem:[#allocation6 + $0x20] sm:$0xf]  ;;  %v1041_v58 = vld [vmem:[#allocation6 + $0x18] sm:$0xff] }
 0x1c3   : > { %v714_v8 = vperm.slane %v710_v4, %v1833_v25  ;;  %v610_v11 = vrot.slane %v598_v1, 4  ;;  %v789_v12 = vsel %vm536_vm2, %v788_v43, %v776_v42  ;;  %v787_v15 = vperm.slane %v783_v59, %v1827_v17 }
 0x1c4   : > { %v716_v13 = vsel %vm536_vm2, %v715_v5, %v702_v2  ;;  %v616_v14 = vrot.slane %v609_v6, 4  ;;  %v793_v10 = vperm.slane %v789_v12, %v1827_v17  ;;  %v794_v21 = vsel %vm536_vm2, %v781_v34, %v1873_v16  ;;  %v1040_v5 = vld [vmem:[#allocation6 + $0x10] sm:$0xff]  ;;  %v1039_v6 = vld [vmem:[#allocation6 + $0x8] sm:$0xff] }
 0x1c5   : > { %v720_v18 = vperm.slane %v716_v13, %v1833_v25  ;;  %v723_v19 = vrot.slane %v714_v8, 4  ;;  %v611_v20 = vsel %vm536_vm2, %v610_v11, %v592_v56  ;;  %v800_v24 = vsel %vm536_vm2, %v799_v52, %v780_v7 }
 0x1c6   : > { %v615_v22 = vperm.slane %v611_v20, %v1833_v25  ;;  %v617_v23 = vsel %vm536_vm2, %v616_v14, %v603_v9  ;;  %v805_v26 = vrot.slane %v793_v10, 4  ;;  %v804_v32 = vperm.slane %v800_v24, %v1827_v17 }
 0x1c7   : > { %v724_v27 = vsel %vm536_vm2, %v720_v18, %v723_v19  ;;  %v721_v29 = vrot.slane %v720_v18, 4  ;;  %v621_v30 = vperm.slane %v617_v23, %v1833_v25  ;;  %v798_v35 = vperm.slane %v794_v21, %v1827_v17 }
 0x1c8   : > { %1339 = vmatpush.xpose.msk.msra.mxu2 %vm821_vm3, %v724_v27  ;;  %v624_v33 = vrot.slane %v615_v22, 4  ;;  %v806_v16 = vsel %vm536_vm2, %v805_v26, %v787_v15  ;;  %v811_v37 = vrot.slane %v804_v32, 4 }
 0x1c9   : > { %v722_v34 = vsel %vm536_vm2, %v721_v29, %v714_v8  ;;  %v810_v36 = vperm.slane %v806_v16, %v1833_v25  ;;  %v622_v38 = vrot.slane %v621_v30, 4 }
 0x1ca   : > { %1337 = vmatpush.xpose.msk.msra.mxu1 %vm821_vm3, %v722_v34  ;;  %v625_v39 = vsel %vm536_vm2, %v621_v30, %v624_v33  ;;  %v812_v40 = vsel %vm536_vm2, %v811_v37, %v798_v35 }
 0x1cb   : > { %1340 = vmatmul.msk.f32.vlgmr.msra.gmra.mxu2 %vm821_vm3, %v625_v39  ;;  %v623_v41 = vsel %vm536_vm2, %v622_v38, %v615_v22  ;;  %v816_v42 = vperm.slane %v812_v40, %v1833_v25  ;;  %v819_v28 = vrot.slane %v810_v36, 4 }
 0x1cd   : > { %1338 = vmatmul.msk.f32.vlgmr.msra.gmra.mxu1 %vm821_vm3, %v623_v41  ;;  %v817_v43 = vrot.slane %v816_v42, 4  ;;  %v820_v45 = vsel %vm536_vm2, %v816_v42, %v819_v28 }
 0x1ce   : > { %1343 = vmatpush.msk.msrb.mxu1 %vm506_vm0, %v1042_v3  ;;  %v1117_v3 = vld [vmem:[%s2101_s7 + $0x30] sm:$0xff] }
 0x1cf   : > { %v818_v44 = vsel %vm536_vm2, %v817_v43, %v810_v36 }
 0x1d0   : > { %915 = vmatpush.msra.mxu3 %v818_v44  ;;  %1065 = vmatpush.msrb.mxu1 %v1041_v58  ;;  %v1116_v58 = vld [vmem:[%s2101_s7 + $0x28] sm:$0xff] }
 0x1d2   : > { %938 = vmatpush.msrb.mxu3 %v820_v45  ;;  %1066 = vmatpush.msrb.mxu1 %v1040_v5  ;;  %v1437_v5 = vld [vmem:[%s2098_s4] ss:$0 sm:$0xff] }
 0x1d4   : > { %1067 = vmatpush.msrb.mxu1 %v1039_v6 }
 0x24a   : > { %v845_v46 = vpop.f32.mrf.mxu1 }
 0x24b   : > { %v875_v47 = vsel %vm874_vm4, %v845_v46, -inf }
 0x24c   : > { %876 = vmax.xlane.f32.xlu2 %v875_v47 }
 0x24e   : > { %v871_v31 = vpop.f32.mrf.mxu2 }
 0x24f   : > { %v878_v48 = vsel %vm874_vm4, %v871_v31, -inf }
 0x254   : > { %879 = vmax.xlane.f32.xlu2 %v878_v48 }
 0x2bf   : > { %v877_v49 = vpop.xlane.xlu2 %876 }
 0x2c0   : > { %v881_v50 = vsub.f32 %v845_v46, %v877_v49 }
 0x2c2   : > { %v883_v51 = vmul.f32 1.442695, %v881_v50 }
 0x2c4   : > { %1441 = vpow2.f32 %v883_v51 }
 0x2c7   : > { %v880_v52 = vpop.xlane.xlu2 %879 }
 0x2c8   : > { %v882_v53 = vsub.f32 %v871_v31, %v880_v52 }
 0x2ca   : > { %v1442_v54 = vpop.eup %1441  ;;  %v885_v55 = vmul.f32 1.442695, %v882_v53 }
 0x2cb   : > { %v887_v56 = vsel %vm874_vm4, %v1442_v54, 0.0 }
 0x2cc   : > { %1443 = vpow2.f32 %v885_v55  ;;  %888 = vadd.xlane.f32.xlu1 %v887_v56 }
 0x2d2   : > { %v1444_v57 = vpop.eup %1443 }
 0x2d3   : > { %v890_v60 = vsel %vm874_vm4, %v1444_v57, 0.0 }
 0x2d4   : > { %891 = vadd.xlane.f32.xlu2 %v890_v60  ;;  %v1077_v60 = vld [vmem:[#allocation8 + $0x20] sm:$0xf] }
 0x2d5   : > { %1345 = vmatpush.msk.msrb.mxu2 %vm506_vm0, %v1077_v60 }
 0x33f   : > { %v889_v61 = vpop.xlane.xlu1 %888 }
 0x340   : > { %1445 = vrcp.f32 %v889_v61  ;;  %v1076_v61 = vld [vmem:[#allocation8 + $0x18] sm:$0xff] }
 0x341   : > { %1100 = vmatpush.msrb.mxu2 %v1076_v61 }
 0x346   : > { %v1446_v63 = vpop.eup %1445 }
 0x347   : > { %v892_v0 = vpop.xlane.xlu2 %891  ;;  %v895_v62 = vmul.f32 %v1446_v63, %v1442_v54 }
 0x348   : > { %1447 = vrcp.f32 %v892_v0 }
 0x349   : > { %1341 = vmatmul.msk.f32.vlgmr.msra.gmra.mxu3 %vm874_vm4, %v895_v62  ;;  %v1073_v62 = vld [vmem:[#allocation8] sm:$0xff] }
 0x34e   : > { %v1448_v1 = vpop.eup %1447 }
 0x34f   : > { %v896_v2 = vmul.f32 %v1448_v1, %v1444_v57  ;;  %v1038_v57 = vld [vmem:[#allocation6] sm:$0xff]  ;;  %v1119_v1 = vld [vmem:[%s2101_s7 + $0x40] sm:$0xff] }
 0x350   : > { %1068 = vmatpush.msrb.mxu1 %v1038_v57  ;;  %1135 = vmatpush.msrb.mxu0 %v1119_v1 }
 0x351   : > { %1342 = vmatmul.msk.f32.vlgmr.msrb.gmra.mxu3 %vm874_vm4, %v896_v2  ;;  %v1118_v2 = vld [vmem:[%s2101_s7 + $0x38] sm:$0xff] }
 0x352   : > { %1136 = vmatpush.msrb.mxu0 %v1118_v2 }
 0x354   : > { %1137 = vmatpush.msrb.mxu0 %v1117_v3 }
 0x356   : > { %1138 = vmatpush.msrb.mxu0 %v1116_v58 }
 0x3cc   : > { %v917_v59 = vpop.f32.mrf.mxu3 }
 0x3cd   : > { %v943_v4 = vrot.slane %v917_v59, 4  ;;  %v948_v8 = vperm.slane %v917_v59, %v1827_v17  ;;  %v1115_v59 = vld [vmem:[%s2101_s7 + $0x20] sm:$0xff] }
 0x3ce   : > { %1139 = vmatpush.msrb.mxu0 %v1115_v59 }
 0x3cf   : > { %v944_v7 = vsel %vm536_vm2, 0.0, %v943_v4  ;;  %v965_v12 = vrot.slane %v948_v8, 4  ;;  %v1114_v4 = vld [vmem:[%s2101_s7 + $0x18] sm:$0xff] }
 0x3d0   : > { %v952_v9 = vperm.slane %v944_v7, %v1827_v17  ;;  %1140 = vmatpush.msrb.mxu0 %v1114_v4 }
 0x3d2   : > { %v977_v19 = vrot.slane %v952_v9, 4 }
 0x3d4   : > { %v940_v11 = vpop.f32.mrf.mxu3 }
 0x3d5   : > { %v953_v13 = vrot.slane %v940_v11, 4  ;;  %v958_v14 = vperm.slane %v940_v11, %v1827_v17  ;;  %v1111_v11 = vld [vmem:[%s2101_s7] sm:$0xff] }
 0x3d7   : > { %v954_v15 = vsel %vm536_vm2, 0.0, %v953_v13  ;;  %v963_v10 = vrot.slane %v958_v14, 4  ;;  %v966_v18 = vsel %vm536_vm2, %v958_v14, %v965_v12  ;;  %v1159_v12 = vld [vmem:[%s2103_s9 + $0x40] sm:$0xff]  ;;  %v1158_v13 = vld [vmem:[%s2103_s9 + $0x38] sm:$0xff]  ;;  %v1157_v14 = vld [vmem:[%s2103_s9 + $0x30] sm:$0xff] }
 0x3d8   : > { %v962_v20 = vperm.slane %v954_v15, %v1827_v17  ;;  %v974_v21 = vperm.slane %v966_v18, %v1833_v25  ;;  %1174 = vmatpush.msra.mxu3 %v1159_v12  ;;  %v1156_v15 = vld [vmem:[%s2103_s9 + $0x28] sm:$0xff]  ;;  %v1154_v18 = vld [vmem:[%s2103_s9 + $0x18] sm:$0xff] }
 0x3d9   : > { %v964_v22 = vsel %vm536_vm2, %v963_v10, %v948_v8  ;;  %v1113_v8 = vld [vmem:[%s2101_s7 + $0x10] sm:$0xff]  ;;  %v1155_v10 = vld [vmem:[%s2103_s9 + $0x20] sm:$0xff] }
 0x3da   : > { %v970_v23 = vperm.slane %v964_v22, %v1833_v25  ;;  %v975_v24 = vrot.slane %v962_v20, 4  ;;  %v978_v26 = vsel %vm536_vm2, %v962_v20, %v977_v19  ;;  %v989_v27 = vrot.slane %v974_v21, 4  ;;  %1141 = vmatpush.msrb.mxu0 %v1113_v8  ;;  %1175 = vmatpush.msra.mxu3 %v1158_v13  ;;  %v1438_v19 = vld [vmem:[%s2100_s6] ss:$0 sm:$0xff] }
 0x3db   : > { %v986_v29 = vperm.slane %v978_v26, %v1833_v25  ;;  %v1152_v26 = vld [vmem:[%s2103_s9 + $0x8] sm:$0xff] }
 0x3dc   : > { %v976_v30 = vsel %vm536_vm2, %v975_v24, %v952_v9  ;;  %v987_v32 = vrot.slane %v970_v23, 4  ;;  %v990_v33 = vsel %vm536_vm2, 0.0, %v989_v27  ;;  %v995_v39 = vsel %vm536_vm2, %v989_v27, %v970_v23  ;;  %v1112_v9 = vld [vmem:[%s2101_s7 + $0x8] sm:$0xff]  ;;  %1176 = vmatpush.msra.mxu3 %v1157_v14  ;;  %v1153_v24 = vld [vmem:[%s2103_s9 + $0x10] sm:$0xff]  ;;  %v1151_v27 = vld [vmem:[%s2103_s9] sm:$0xff] }
 0x3dd   : > { %v982_v35 = vperm.slane %v976_v30, %v1833_v25  ;;  %v993_v16 = vrot.slane %v986_v29, 4  ;;  %v1000_v34 = vrot.slane %v990_v33, 4  ;;  %v999_v43 = vperm.slane %v995_v39, %v1827_v17  ;;  %1142 = vmatpush.msrb.mxu0 %v1112_v9  ;;  %v1439_v29 = vld [vmem:[%s2102_s8] ss:$0 sm:$0xff] }
 0x3de   : > { %v988_v36 = vsel %vm536_vm2, 0.0, %v987_v32  ;;  %1177 = vmatpush.msra.mxu3 %v1156_v15 }
 0x3df   : > { %v991_v37 = vrot.slane %v982_v35, 4  ;;  %v994_v38 = vsel %vm536_vm2, 0.0, %v993_v16  ;;  %v1001_v40 = vsel %vm536_vm2, %v1000_v34, %v988_v36  ;;  %v1006_v44 = vsel %vm536_vm2, %v993_v16, %v982_v35  ;;  %1143 = vmatpush.msrb.mxu0 %v1111_v11  ;;  %v1191_v16 = vld [vmem:[#allocation2] sm:$0x1] }
 0x3e0   : > { %v1011_v41 = vrot.slane %v994_v38, 4  ;;  %v1005_v42 = vperm.slane %v1001_v40, %v1827_v17  ;;  %v1010_v48 = vperm.slane %v1006_v44, %v1827_v17  ;;  %1178 = vmatpush.msra.mxu3 %v1155_v10  ;;  %v1621_v34 = vmov 0   ;;  %v1440_v36 = vld [vmem:[%s2104_s10] ss:$0 sm:$0xff] }
 0x3e1   : > { %v992_v28 = vsel %vm536_vm2, 0.0, %v991_v37  ;;  %1434 = vset.pattern.permute.xlu2 %v1621_v34  ;;  %1435 = vset.pattern.permute.xlu0 %v1621_v34 }
 0x3e2   : > { %v1012_v45 = vsel %vm536_vm2, %v1011_v41, %v992_v28  ;;  %v1017_v46 = vrot.slane %v1005_v42, 4  ;;  %1179 = vmatpush.msra.mxu3 %v1154_v18  ;;  %1194 = vperm.xlu2 %1434, %v1191_v16   ;;  %v1190_v41 = vld [vmem:[%s2105_s11] sm:$0x1] }
 0x3e3   : > { %v1016_v47 = vperm.slane %v1012_v45, %v1827_v17  ;;  %v1075_v17 = vld [vmem:[#allocation8 + $0x10] sm:$0xff] }
 0x3e4   : > { %v1018_v31 = vsel %vm536_vm2, %v1017_v46, %v999_v43  ;;  %1101 = vmatpush.msrb.mxu2 %v1075_v17  ;;  %1180 = vmatpush.msra.mxu3 %v1153_v24 }
 0x3e5   : > { %v1022_v49 = vperm.slane %v1018_v31, %v1833_v25  ;;  %v1023_v50 = vrot.slane %v1016_v47, 4 }
 0x3e6   : > { %1181 = vmatpush.msra.mxu3 %v1152_v26 }
 0x3e7   : > { %v1024_v51 = vsel %vm536_vm2, %v1023_v50, %v1010_v48  ;;  %v1031_v52 = vrot.slane %v1022_v49, 4 }
 0x3e8   : > { %v1028_v53 = vperm.slane %v1024_v51, %v1833_v25  ;;  %v1074_v25 = vld [vmem:[#allocation8 + $0x8] sm:$0xff]  ;;  %1182 = vmatpush.msra.mxu3 %v1151_v27 }
 0x3e9   : > { %1102 = vmatpush.msrb.mxu2 %v1074_v25 }
 0x3ea   : > { %v1032_v54 = vsel %vm536_vm2, %v1028_v53, %v1031_v52  ;;  %v1029_v55 = vrot.slane %v1028_v53, 4 }
 0x3eb   : > { %1034 = vrot.lane.b32.xlu0 %v1032_v54, %s1620_s25  ;;  %1103 = vmatpush.msrb.mxu2 %v1073_v62 }
 0x3ec   : > { %v1030_v56 = vsel %vm536_vm2, %v1029_v55, %v1022_v49 }
 0x43c   : > { %v1195_v42 = vpop.permute.xlu2 %1194 }
 0x43d   : > { %v1197_v28 = vperm.slane %v1195_v42, 0 }
 0x45d   : > { %v1035_v63 = vpop.permute.xlu0 %1034 }
 0x45e   : > { %v1037_v0 = vsel %vm821_vm3, %v1030_v56, %v1035_v63 }
 0x45f   : > { %1344 = vmatmul.msk.f32.vlgmr.msrb.gmra.mxu1 %vm502_vm1, %v1037_v0 }
 0x4dc   : > { %v1070_v6 = vpop.f32.mrf.mxu1 }
 0x4dd   : > { %v1071_v7 = vadd.f32 %v1437_v5, %v1070_v6 }
 0x4df   : > { %1346 = vmatmul.msk.f32.vlgmr.msrb.gmra.mxu2 %vm502_vm1, %v1071_v7 }
 0x562   : > { %v1105_v20 = vpop.f32.mrf.mxu2 }
 0x563   : > { %v1106_v21 = vadd.f32 %v1438_v19, %v1105_v20 }
 0x565   : > { %vm1108_vm5 = vcmp.ge.f32.partialorder %v1106_v21, 0.0  ;;  %v1109_v22 = vmul.f32 0.2, %v1106_v21 }
 0x567   : > { %v1110_v23 = vsel %vm1108_vm5, %v1106_v21, %v1109_v22 }
 0x568   : > { %1347 = vmatmul.msk.f32.vlgmr.msrb.gmra.mxu0 %vm1124_vm6, %v1110_v23 }
 0x5e5   : > { %v1145_v30 = vpop.f32.mrf.mxu0 }
 0x5e6   : > { %v1146_v32 = vadd.f32 %v1439_v29, %v1145_v30 }
 0x5e8   : > { %vm1148_vm7 = vcmp.ge.f32.partialorder %v1146_v32, 0.0  ;;  %v1149_v33 = vmul.f32 0.2, %v1146_v32 }
 0x5ea   : > { %v1150_v35 = vsel %vm1148_vm7, %v1146_v32, %v1149_v33 }
 0x5eb   : > { %1348 = vmatmul.msk.f32.vlgmr.msra.gmra.mxu3 %vm1124_vm6, %v1150_v35 }
 0x66e   : > { %v1184_v37 = vpop.f32.mrf.mxu3 }
 0x66f   : > { %v1185_v38 = vadd.f32 %v1440_v36, %v1184_v37 }
 0x671   : > { %vm1187_vm8 = vcmp.ge.f32.partialorder %v1185_v38, 0.0  ;;  %v1188_v39 = vmul.f32 0.2, %v1185_v38 }
 0x673   : > { %v1189_v40 = vsel %vm1187_vm8, %v1185_v38, %v1188_v39 }
 0x674   : > { %1349 = vmatpush.xpose.msk.msra.mxu1 %vm502_vm1, %v1189_v40 }
 0x677   : > { %1350 = vmatmul.msk.f32.vlgmr.msra.gmra.mxu1 %vm502_vm1, %v1190_v41 }
 0x6f4   : > { %v1221_v43 = vpop.f32.mrf.mxu1 }
 0x6f5   : > { %v1222_v44 = vadd.f32 %v1221_v43, %v1197_v28 }
 0x6f7   : > { %1225 = vst.msk [vmem:[%s491_s15] sm:$0x1] %vm1224_vm9, %v1222_v44 }
 0x6f8   : > { %1566 = shalt.err (!%p1563_p9)
}
 0x6f9   : > { %1363 = dma.vmem_to_hbm [thread:$0]  (%p1764_p4), %s1238_s24, 16, %s1240_s12, %s1227_s5  }
 0x6fa PF: > { %s2128_s19 = sld [smem:[#allocation13_spill]]  ;;  %p2130_p10 = scmp.ge.s32.totalorder %s1609_s30, 2 }
 0x6fc   : > { %p1377_p13 = pnand %p2130_p10, %p1768_p6 }
 0x6fe   : > { %p1378_p11 = pneg %p1377_p13 }
 0x700   : > { %s1251_s29 = sand.u32 1, %s2128_s19  }
 0x701   : > { %s1252_s17 = scalar_lea.sflag [#allocation5], %s1251_s29 }
 0x702   : > { %1592 = dma.done.wait (%p1378_p11), %s1252_s17, 16  }
 0x703   : > { %1594 = vsyncadd (%p1378_p11), %s1252_s17, 4294967280  ;;  %s2131_s30 = sld [smem:[#allocation15_spill]]  ;;  %s2134_s27 = smov %s1601_s28 }
 0x704   : > { %s2132_s14 = sld [smem:[#allocation14_spill]] }
 0x705   : > { %s2133_s29 = sld [smem:[#allocation16_spill]] }
 0x709   : > { %p29_p0 = scmp.ge.s32.totalorder %s2131_s30, 4  }
 0x70a   : > { %s2135_s28 = smov %s2132_s14 }
 0x70b   :  { %31 = sbr.rel (!%p29_p0) target bundleno = 9 (0x9), region = 125 }
 0x710   :  { %1257 = vsyncpa [#allocation4], 1 }
 0x711   :  { %1259 = vsyncpa [#allocation4 + $0x1], 1 }
 0x712   :  { %1260 = vsyncpa [#allocation7], 1 }
 0x713   :  { %1261 = vsyncpa [#allocation5], 1 }
 0x714   :  { %1263 = vsyncpa [#allocation5 + $0x1], 1 }

</bundles_post_ra>
